<compile_context>
chip_gen: v7x
topology: tpu7x:2x2x1
jax: 0.10.0
libtpu: 0.0.40
codegen_flags: <defaults>
</compile_context>

<pallas_src>
import jax
import jax.numpy as jnp
from jax.experimental import pallas as pl
from jax.experimental.pallas import tpu as pltpu

INPUT_DIM = 10
HIDDEN_DIM = 64
OUTPUT_DIM = 2


def simple_nn_kernel(x_ref, w1_ref, b1_ref, w2b2d_ref, out_ref):
    # fc1 + ReLU  (MXU matmul with f32 accumulation, VPU bias add / max)
    x = x_ref[...]                                    # (B, INPUT_DIM)
    h = jnp.dot(x, w1_ref[...], preferred_element_type=jnp.float32) + b1_ref[...]
    h = jnp.maximum(h, 0.0)                           # (B, HIDDEN_DIM)

    # fc2 with the 2-class softmax difference matrix pre-folded into the
    # weights: d[:, i] = logit_other - logit_i.  Both slices (rows [0:64] and
    # [64:65]) are sublane-aligned static views.
    w2d = w2b2d_ref[:HIDDEN_DIM, :]                   # (HIDDEN_DIM, OUTPUT_DIM)
    b2d = w2b2d_ref[HIDDEN_DIM:, :]                   # (1, OUTPUT_DIM)
    d = jnp.dot(h, w2d, preferred_element_type=jnp.float32) + b2d   # (B, 2)

    # softmax_i = 1 / (1 + exp(l_other - l_i)).  Stable: exp overflow -> p = 0.
    # Exact divide kept (pl.reciprocal(approx=True) would break 1e-5 parity).
    out_ref[...] = (1.0 / (1.0 + jnp.exp(d))).astype(out_ref.dtype)


def simple_nn_forward(x, w1, b1, w2b2d):
    batch = x.shape[0]
    return pl.pallas_call(
        simple_nn_kernel,
        out_shape=jax.ShapeDtypeStruct((batch, OUTPUT_DIM), jnp.float32),
        in_specs=[
            pl.BlockSpec(memory_space=pltpu.MemorySpace.VMEM),   # x
            pl.BlockSpec(memory_space=pltpu.MemorySpace.VMEM),   # w1
            pl.BlockSpec(memory_space=pltpu.MemorySpace.VMEM),   # b1
            pl.BlockSpec(memory_space=pltpu.MemorySpace.VMEM),   # [W2@D; b2@D]
        ],
        out_specs=pl.BlockSpec(memory_space=pltpu.MemorySpace.VMEM),
    )(x, w1, b1, w2b2d)


def init_params(key):
    # PyTorch nn.Linear default init: U(-1/sqrt(fan_in), 1/sqrt(fan_in)) for
    # both weight and bias.  Weights stored as (in, out) so the kernel does
    # x @ W directly.
    k1, k2, k3, k4 = jax.random.split(key, 4)
    bound1 = 1.0 / jnp.sqrt(INPUT_DIM)
    bound2 = 1.0 / jnp.sqrt(HIDDEN_DIM)
    w1 = jax.random.uniform(k1, (INPUT_DIM, HIDDEN_DIM), jnp.float32,
                            minval=-bound1, maxval=bound1)
    b1 = jax.random.uniform(k2, (1, HIDDEN_DIM), jnp.float32,
                            minval=-bound1, maxval=bound1)
    w2 = jax.random.uniform(k3, (HIDDEN_DIM, OUTPUT_DIM), jnp.float32,
                            minval=-bound2, maxval=bound2)
    b2 = jax.random.uniform(k4, (1, OUTPUT_DIM), jnp.float32,
                            minval=-bound2, maxval=bound2)
    return w1, b1, w2, b2


def pack_params(w1, b1, w2, b2):
    # One-time pack (outside the per-call path):
    #  * b1 stays a separate (1, HIDDEN_DIM) tensor (aligned, no in-kernel slice
    #    at the non-8-multiple row 10).
    #  * fc2 gets the 2-class softmax difference matrix folded in:
    #      d = (h @ W2 + b2) @ D = h @ (W2 @ D) + (b2 @ D),  D = [[-1,1],[1,-1]]
    #    and is packed as [W2@D; b2@D] with the bias at the aligned row 64.
    D = jnp.array([[-1.0, 1.0], [1.0, -1.0]], jnp.float32)
    w2b2d = jnp.concatenate([w2 @ D, b2 @ D], axis=0)   # (HIDDEN_DIM + 1, OUTPUT_DIM)
    return w1, b1, w2b2d


if __name__ == "__main__":
    key = jax.random.PRNGKey(0)
    k_params, k_x = jax.random.split(key)
    w1, b1, w2, b2 = init_params(k_params)
    w1p, b1p, w2b2d = pack_params(w1, b1, w2, b2)

    batch = 8
    x = jax.random.normal(k_x, (batch, INPUT_DIM), jnp.float32)

    out = jax.block_until_ready(simple_nn_forward(x, w1p, b1p, w2b2d))

    # Pure-JAX reference of the original module: fc1 -> ReLU -> fc2 -> softmax.
    h_ref = jnp.maximum(x @ w1 + b1, 0.0)
    ref = jax.nn.softmax(h_ref @ w2 + b2, axis=1)
    assert out.shape == (batch, OUTPUT_DIM)
    assert jnp.allclose(out, ref, atol=1e-5, rtol=1e-5)

    print("KERNEL_OK")
</pallas_src>

<mosaic_0001>
module attributes {stable_mosaic.version = 11 : i64} {
  func.func @simple_nn_kernel(%arg0: memref<8x10xf32, #tpu.memory_space<vmem>>, %arg1: memref<10x64xf32, #tpu.memory_space<vmem>>, %arg2: memref<1x64xf32, #tpu.memory_space<vmem>>, %arg3: memref<65x2xf32, #tpu.memory_space<vmem>>, %arg4: memref<8x2xf32, #tpu.memory_space<vmem>>) attributes {dimension_semantics = [], scalar_prefetch = 0 : i64, scratch_operands = 0 : i64, tpu.core_type = #tpu.core_type<tc>} {
    %c0 = arith.constant 0 : index
    %c0_0 = arith.constant 0 : index
    %0 = vector.load %arg0[%c0, %c0_0] : memref<8x10xf32, #tpu.memory_space<vmem>>, vector<8x10xf32>
    %c0_1 = arith.constant 0 : index
    %c0_2 = arith.constant 0 : index
    %1 = vector.load %arg1[%c0_1, %c0_2] : memref<10x64xf32, #tpu.memory_space<vmem>>, vector<10x64xf32>
    %cst = arith.constant dense<0.000000e+00> : vector<8x64xf32>
    %2 = tpu.matmul %0, %1, %cst {dimension_numbers = #tpu.dot_dimension_numbers<[1], [0], [0], [1], [0, 0, 1, 1], [], []>} : vector<8x10xf32>, vector<10x64xf32>, vector<8x64xf32> -> vector<8x64xf32>
    %c0_3 = arith.constant 0 : index
    %c0_4 = arith.constant 0 : index
    %3 = vector.load %arg2[%c0_3, %c0_4] : memref<1x64xf32, #tpu.memory_space<vmem>>, vector<1x64xf32>
    %4 = vector.broadcast %3 : vector<1x64xf32> to vector<8x64xf32>
    %5 = arith.addf %2, %4 : vector<8x64xf32>
    %cst_5 = arith.constant 0.000000e+00 : f32
    %6 = vector.broadcast %cst_5 : f32 to vector<8x64xf32>
    %7 = arith.maximumf %5, %6 : vector<8x64xf32>
    %c0_6 = arith.constant 0 : index
    %c0_7 = arith.constant 0 : index
    %8 = vector.load %arg3[%c0_6, %c0_7] : memref<65x2xf32, #tpu.memory_space<vmem>>, vector<64x2xf32>
    %c64 = arith.constant 64 : index
    %c0_8 = arith.constant 0 : index
    %9 = vector.load %arg3[%c64, %c0_8] : memref<65x2xf32, #tpu.memory_space<vmem>>, vector<1x2xf32>
    %cst_9 = arith.constant dense<0.000000e+00> : vector<8x2xf32>
    %10 = tpu.matmul %7, %8, %cst_9 {dimension_numbers = #tpu.dot_dimension_numbers<[1], [0], [0], [1], [0, 0, 1, 1], [], []>} : vector<8x64xf32>, vector<64x2xf32>, vector<8x2xf32> -> vector<8x2xf32>
    %11 = vector.broadcast %9 : vector<1x2xf32> to vector<8x2xf32>
    %12 = arith.addf %10, %11 : vector<8x2xf32>
    %13 = math.exp %12 : vector<8x2xf32>
    %cst_10 = arith.constant 1.000000e+00 : f32
    %14 = vector.broadcast %cst_10 : f32 to vector<8x2xf32>
    %15 = arith.addf %14, %13 : vector<8x2xf32>
    %cst_11 = arith.constant 1.000000e+00 : f32
    %16 = vector.broadcast %cst_11 : f32 to vector<8x2xf32>
    %17 = arith.divf %16, %15 : vector<8x2xf32>
    %c0_12 = arith.constant 0 : index
    %c0_13 = arith.constant 0 : index
    %18 = vector.load %arg4[%c0_12, %c0_13] : memref<8x2xf32, #tpu.memory_space<vmem>>, vector<8x2xf32>
    tpu.vector_store %arg4[%c0_12, %c0_13], %17 {strides = array<i32>} : memref<8x2xf32, #tpu.memory_space<vmem>>, vector<8x2xf32>,
    return
  }
}

</mosaic_0001>

<bundles_post_ra>
// kernel: tpu_custom_call.1
= control target key start
LH: loop header
LB: loop body
LE: loop exit
PB: predicated region body
PF: predicated region fallthrough
CT: control target
= control target key end

     0   :  { %vm31_vm0 = vcmask 1041408   ;;  %v271_v0 = vmov 0.0|0.0   ;;  %vm272_vm1 = vmmov 1   ;;  %vm273_vm3 = vmmov 0   ;;  %s342_s1 = inlined_call_operand.vmem [shape: f32[10,64], index: 1, kind: input, shape index: {}]   ;;  %s343_s3 = inlined_call_operand.vmem [shape: f32[65,2], index: 3, kind: input, shape index: {}]   ;;  %s344_s0 = inlined_call_operand.vmem [shape: f32[8,10], index: 0, kind: input, shape index: {}]   ;;  %s345_s2 = inlined_call_operand.vmem [shape: f32[1,64], index: 2, kind: input, shape index: {}]   ;;  %s346_s4 = inlined_call_operand.vmem [shape: f32[8,2], index: 4, kind: output, shape index: {}]  }
   0x1   :  { %247 = vmatprep.subr.bf16.mxu0 %v271_v0  ;;  %v18_v1 = vld [vmem:[%s342_s1] sm:$0xff]  ;;  %v19_v2 = vld [vmem:[%s342_s1 + $0x8] sm:$0x3]  ;;  %vm249_vm2 = vmpackc.low %vm31_vm0, %vm272_vm1  ;;  %251 = vmatprep.subr.bf16.mxu1 %v271_v0  ;;  %v274_v4 = vmov 0.0   ;;  %vm27_vm4 = vcmask 80896   ;;  %vm119_vm5 = vcmask 523264  }
   0x2   :  { %v248_v3 = vpack.c.bf16 %v19_v2, %v18_v1  ;;  %225 = vmatprep.mubr.msk.f32.mxu0 %vm273_vm3, %v274_v4  ;;  %v106_v5 = vld [vmem:[%s343_s3] sm:$0xff]  ;;  %v107_v6 = vld [vmem:[%s343_s3 + $0x8] sm:$0xff]  ;;  %244 = vmatprep.mubr.msk.f32.mxu1 %vm273_vm3, %v274_v4  ;;  %v108_v8 = vld [vmem:[%s343_s3 + $0x10] sm:$0xff]  ;;  %vm198_vm6 = vcmask 15360  }
   0x3   :  { %v252_v7 = vpack.c.bf16 %v107_v6, %v106_v5  ;;  %v109_v9 = vld [vmem:[%s343_s3 + $0x18] sm:$0xff]  ;;  %v17_v10 = vld [vmem:[%s344_s0] sm:$0xff]  ;;  %v111_v13 = vld [vmem:[%s343_s3 + $0x28] sm:$0xff] }
   0x4   :  { %250 = vmatpush3.bf16.msk.msra.mxu0 %vm249_vm2, %v248_v3  ;;  %v255_v11 = vpack.c.bf16 %v109_v9, %v108_v8  ;;  %v110_v12 = vld [vmem:[%s343_s3 + $0x20] sm:$0xff]  ;;  %v112_v15 = vld [vmem:[%s343_s3 + $0x30] sm:$0xff]  ;;  %v113_v16 = vld [vmem:[%s343_s3 + $0x38] sm:$0xff] }
   0x5   :  { %253 = vmatpush3.bf16.msra.mxu1 %v252_v7  ;;  %v258_v14 = vpack.c.bf16 %v111_v13, %v110_v12  ;;  %v261_v17 = vpack.c.bf16 %v113_v16, %v112_v15  ;;  %v204_v18 = vld [vmem:[%s345_s2] ss:$0 sm:$0xff] }
   0x6   :  { %254 = vmatprep.subr.bf16.mxu1 %v271_v0  ;;  %v207_v23 = vld [vmem:[%s343_s3 + $0x40] ss:$0 sm:$0xff] }
   0x7   :  { %226 = vmatmul.mubr.msk.f32.vlgmr.msra.gmra.mrb[0].mxu0 %vm27_vm4, %v17_v10 }
   0x9   :  { %256 = vmatpush3.bf16.msra.mxu1 %v255_v11 }
   0xa   :  { %257 = vmatprep.subr.bf16.mxu1 %v271_v0 }
   0xd   :  { %259 = vmatpush3.bf16.msra.mxu1 %v258_v14 }
   0xe   :  { %260 = vmatprep.subr.bf16.mxu1 %v271_v0 }
  0x11   :  { %262 = vmatpush3.bf16.msra.mxu1 %v261_v17 }
  0xda   :  { %v101_v19 = vpop.f32.mrb[0].mxu0 }
  0xdb   :  { %v102_v20 = vadd.f32 %v204_v18, %v101_v19  ;;  %v227_v21 = vpop.f32.mrb[1].mxu0 }
  0xdd   :  { %v105_v22 = vmax.f32 %v102_v20, 0.0 }
  0xdf   :  { %245 = vmatmul.mubr.msk.f32.vlgmr.msra.gmra.mrb[0].mxu1 %vm119_vm5, %v105_v22 }
 0x1b2   :  { %v189_v24 = vpop.f32.mrb[0].mxu1 }
 0x1b3   :  { %v190_v25 = vadd.f32 %v207_v23, %v189_v24  ;;  %v246_v26 = vpop.f32.mrb[1].mxu1 }
 0x1b5   :  { %v193_v27 = vmul.f32 1.442695, %v190_v25 }
 0x1b7   :  { %267 = vpow2.f32 %v193_v27 }
 0x1c1   :  { %v268_v28 = vpop.eup %267 }
 0x1c2   :  { %v195_v29 = vadd.f32 1.0, %v268_v28 }
 0x1c4   :  { %269 = vrcp.f32 %v195_v29 }
 0x1ce   :  { %v270_v30 = vpop.eup %269 }
 0x1cf   :  { %199 = vst.msk [vmem:[%s346_s4] sm:$0xff] %vm198_vm6, %v270_v30 }

</bundles_post_ra>
